<compile_context>
chip_gen: v7x
topology: tpu7x:2x2x1
jax: 0.10.0
libtpu: 0.0.40
codegen_flags: <defaults>
</compile_context>

<pallas_src>
import functools

import jax
import jax.numpy as jnp
from jax import lax
from jax.experimental import pallas as pl
from jax.experimental.pallas import tpu as pltpu

HP = 128          # padded hidden/feature lane width
MASK_BIG = 1e9    # additive softmax mask magnitude


def _gat_classifier_kernel(x_ref, adj_ref, ea_ref, pool_ref, c_ref,
                           w_ref, vecs_ref, out_ref, *, hid):
    g, np_, hp = x_ref.shape
    bp = pool_ref.shape[1]

    vecs = vecs_ref[...]                                   # (8, HP)  f32 packed rows
    adjf = adj_ref[...].astype(jnp.float32)                # (G, NP, NP)
    eaf = ea_ref[...].astype(jnp.float32)                  # (G, NP, NP)
    mask_bias = (adjf - 1.0) * MASK_BIG                    # 0 on edges/self-loops, -BIG elsewhere

    # att_src rows, broadcast once (hoisted; JAX does not CSE broadcast_in_dim).
    as1 = jnp.broadcast_to(vecs[6:7, :].reshape(1, 1, hp), (g, 1, hp))
    as2 = jnp.broadcast_to(vecs[7:8, :].reshape(1, 1, hp), (g, 1, hp))

    def gat_layer(xin_bf, w_aug, bias_row, att_src_b, c_edge):
        # Projection on the MXU with M = G*NP rows; column `hid` of w_aug holds W @ att_dst,
        # so the destination attention score falls out of the same bf16 MXU pass.
        h = jnp.dot(xin_bf, w_aug, preferred_element_type=jnp.float32)      # (G*NP, HP) f32
        h3 = h.reshape(g, np_, hp)
        a_dst = h3[:, :, hid:hid + 1]                                       # (G, NP, 1)
        # Source score directly along the lane axis via a batched MXU pass (no XLU
        # cross-lane reduce + sublane->lane relayout).
        a_src = lax.dot_general(att_src_b, h3,
                                dimension_numbers=(((2,), (2,)), ((0,), (0,))),
                                preferred_element_type=jnp.float32)         # (G, 1, NP)
        logits = a_dst + a_src + c_edge * eaf                               # (G, NP, NP)
        lk = 0.6 * logits + 0.4 * jnp.abs(logits)                           # LeakyReLU(0.2)
        lk = lk + mask_bias                                                 # additive mask
        m = jnp.max(lk, axis=-1, keepdims=True)                             # max over VALID only
        p = jnp.exp(lk - m)                                                 # masked -> exactly 0
        rowsum = jnp.sum(p, axis=-1, keepdims=True)                         # >= 1 via self loops
        agg = lax.dot_general(p, h3,
                              dimension_numbers=(((2,), (1,)), ((0,), (0,))),
                              preferred_element_type=jnp.float32)           # (G, NP, HP)
        # Normalize after the matmul: O(N*HP) multiply with an EUP reciprocal instead of an
        # O(N^2) VALU divide over the attention tile.
        return agg * pl.reciprocal(rowsum, approx=True) + bias_row

    # GAT layer 1 + ReLU, then GAT layer 2.  Junk in padded activation columns (incl. the
    # fused att_dst column) is killed downstream by zero rows of the padded weights; padded
    # node rows only ever see their own self-loop and never reach the output (pool cols = 0).
    x_bf = x_ref[...].reshape(g * np_, hp)                                  # bf16
    h1 = jnp.maximum(gat_layer(x_bf, w_ref[0], vecs[0:1, :], as1, c_ref[0]), 0.0)
    h1_bf = h1.reshape(g * np_, hp).astype(jnp.bfloat16)
    h2 = gat_layer(h1_bf, w_ref[1], vecs[1:2, :], as2, c_ref[1])            # (G, NP, HP) f32

    # global_mean_pool: row-normalized membership matrix, batched over G.
    gp = lax.dot_general(pool_ref[...], h2,
                         dimension_numbers=(((2,), (1,)), ((0,), (0,))),
                         preferred_element_type=jnp.float32)                # (G, BP, HP)

    # MLP head: Linear -> ReLU -> LayerNorm(hid) -> Linear (lane-dense; padded cols of z == 0).
    gf = gp.reshape(g * bp, hp).astype(jnp.bfloat16)
    z = jnp.dot(gf, w_ref[2], preferred_element_type=jnp.float32) + vecs[2:3, :]
    z = jnp.maximum(z, 0.0)
    inv_hid = 1.0 / float(hid)
    mu = jnp.sum(z, axis=-1, keepdims=True) * inv_hid              # padded cols are exactly 0
    ex2 = jnp.sum(z * z, axis=-1, keepdims=True) * inv_hid
    var = jnp.maximum(ex2 - mu * mu, 0.0)
    zn = (z - mu) * lax.rsqrt(var + 1e-5)
    zn = zn * vecs[3:4, :] + vecs[4:5, :]                          # gamma/beta (0 in padded cols)
    out = jnp.dot(zn.astype(jnp.bfloat16), w_ref[3],
                  preferred_element_type=jnp.float32) + vecs[5:6, :]
    out_ref[...] = out.reshape(g, bp, hp)


def _round_up(v, m):
    return ((v + m - 1) // m) * m


def _choose_gblk(gb, np_, target_rows=256):
    """Graph-batches per grid step: fill the MXU M dim up to ~256 rows (v6e/v7x)."""
    g = max(1, min(gb, max(1, target_rows // np_)))
    while gb % g:
        g -= 1
    return g


def _gat_forward(xs, adjs, eas, pools, c_edge, wstack, vecs, *, hid):
    gb, np_, hp = xs.shape
    bp = pools.shape[1]
    gblk = _choose_gblk(gb, np_)

    # Explicit VMEM budget: double-buffered per-step blocks + resident params + headroom for
    # kernel intermediates; clipped to 64 MiB so the same sizing is valid on v7x.
    blk_bytes = (gblk * np_ * hp * 2            # x (bf16)
                 + 2 * gblk * np_ * np_ * 2     # adj + ea (bf16)
                 + gblk * bp * np_ * 4          # pool (f32)
                 + gblk * bp * hp * 4)          # out (f32)
    resident = 4 * hp * hp * 2 + 8 * hp * 4     # wstack (bf16) + vecs (f32)
    vmem_limit = min(max(4 * blk_bytes + resident + (8 << 20), 32 << 20), 64 << 20)

    kernel = functools.partial(_gat_classifier_kernel, hid=hid)
    return pl.pallas_call(
        kernel,
        out_shape=jax.ShapeDtypeStruct((gb, bp, hp), jnp.float32),
        grid=(gb // gblk,),
        in_specs=[
            pl.BlockSpec((gblk, np_, hp), lambda b: (b, 0, 0)),    # x    (bf16)
            pl.BlockSpec((gblk, np_, np_), lambda b: (b, 0, 0)),   # adj  (bf16)
            pl.BlockSpec((gblk, np_, np_), lambda b: (b, 0, 0)),   # ea   (bf16)
            pl.BlockSpec((gblk, bp, np_), lambda b: (b, 0, 0)),    # pool (f32)
            pl.BlockSpec(memory_space=pltpu.MemorySpace.SMEM),     # c_edge (2,) scalars
            pl.BlockSpec((4, hp, hp), lambda b: (0, 0, 0)),        # packed weight stack
            pl.BlockSpec((8, hp), lambda b: (0, 0)),               # packed vector slab
        ],
        out_specs=pl.BlockSpec((gblk, bp, hp), lambda b: (b, 0, 0)),
        compiler_params=pltpu.CompilerParams(
            dimension_semantics=("parallel",),     # shards across both TCs on v7x when GB >= 2
            vmem_limit_bytes=vmem_limit),
    )(xs, adjs, eas, pools, c_edge, wstack, vecs)


def densify_graph(x, edge_index, edge_attr, batch_idx, num_graphs):
    """Dense padded operands for the kernel (bf16 for the O(N^2) arrays).

    TODO(synk): for static graph topologies, cache this output across calls (or build adj/ea
    in-kernel from SMEM edge lists via scalar prefetch) -- the XLA scatter re-materializes
    two NP^2 arrays in HBM every call and dominates end-to-end cost at small kernel sizes.
    """
    n, in_ch = x.shape
    np_ = _round_up(max(n, 8), 8)
    bp = _round_up(max(num_graphs, 8), 8)
    src, dst = edge_index[0], edge_index[1]

    # Densify: edge j -> i stored at [i, j].
    # TODO(synk): duplicate (src,dst) pairs collapse here (last attr wins) whereas PyG GATConv
    # softmaxes each parallel edge separately; fine for the demo's deterministic edge set.
    adj = jnp.zeros((np_, np_), jnp.float32).at[dst, src].set(1.0)
    ea = jnp.zeros((np_, np_), jnp.float32).at[dst, src].set(edge_attr[:, 0])

    # GATConv add_self_loops(fill_value='mean'): self-loop attr = mean of incoming attrs.
    deg = jnp.zeros((np_,), jnp.float32).at[dst].add(1.0)
    ea_sum = jnp.zeros((np_,), jnp.float32).at[dst].add(edge_attr[:, 0])
    self_ea = jnp.where(deg > 0, ea_sum / jnp.maximum(deg, 1.0), 0.0)
    diag = jnp.arange(np_)
    adj = adj.at[diag, diag].set(1.0)      # also keeps padded-node rows non-empty
    ea = ea.at[diag, diag].set(self_ea)

    # Zero-pad node features to the 128-lane slab the kernel expects.
    xp = jnp.zeros((np_, HP), jnp.float32).at[:n, :in_ch].set(x)

    # Row-normalized mean-pool membership matrix, padded to (bp, np_).
    onehot = (batch_idx[None, :] == jnp.arange(bp)[:, None]).astype(jnp.float32)
    counts = jnp.maximum(jnp.sum(onehot, axis=1, keepdims=True), 1.0)
    pool = jnp.zeros((bp, np_), jnp.float32).at[:, :n].set(onehot / counts)

    return (xp.astype(jnp.bfloat16), adj.astype(jnp.bfloat16),
            ea.astype(jnp.bfloat16), pool)


@functools.partial(jax.jit, static_argnames=("num_graphs", "hid", "out_ch"))
def gat_graph_classifier(x, edge_index, edge_attr, batch_idx, packed,
                         num_graphs, hid, out_ch):
    """Matches GATGraphClassifier.forward: returns (lin(pool(gat2(relu(gat1)))), edge_attr)."""
    xp, adj, ea, pool = densify_graph(x, edge_index, edge_attr, batch_idx, num_graphs)
    # Leading graph-batch axis (GB=1 == one module forward); stack many PyG batches along it to
    # fill the MXU M dimension (G*NP rows per grid step) and both v7x TensorCores.
    out = _gat_forward(xp[None], adj[None], ea[None], pool[None],
                       packed["c_edge"], packed["wstack"], packed["vecs"], hid=hid)
    return out[0, :num_graphs, :out_ch], edge_attr


def pack_params(params, in_ch, hid, out_ch, hp=HP):
    """Fold the per-tensor module parameters into 3 kernel operands (done once at init)."""
    assert hid + 1 <= hp and in_ch <= hp and out_ch <= hp
    w1, w2 = params["w1"], params["w2"]
    w1_aug = jnp.zeros((hp, hp), jnp.float32).at[:in_ch, :hid].set(w1)
    w1_aug = w1_aug.at[:in_ch, hid].set(w1 @ params["ad1"][0])       # fused att_dst, layer 1
    w2_aug = jnp.zeros((hp, hp), jnp.float32).at[:hid, :hid].set(w2)
    w2_aug = w2_aug.at[:hid, hid].set(w2 @ params["ad2"][0])         # fused att_dst, layer 2
    lw1 = jnp.zeros((hp, hp), jnp.float32).at[:hid, :hid].set(params["lw1"])
    lw2 = jnp.zeros((hp, hp), jnp.float32).at[:hid, :out_ch].set(params["lw2"])
    wstack = jnp.stack([w1_aug, w2_aug, lw1, lw2]).astype(jnp.bfloat16)   # (4, hp, hp) bf16

    vecs = jnp.zeros((8, hp), jnp.float32)
    vecs = vecs.at[0, :hid].set(params["b1"][0])      # GAT1 bias
    vecs = vecs.at[1, :hid].set(params["b2"][0])      # GAT2 bias
    vecs = vecs.at[2, :hid].set(params["lb1"][0])     # head Linear1 bias
    vecs = vecs.at[3, :hid].set(params["lng"][0])     # LayerNorm gamma
    vecs = vecs.at[4, :hid].set(params["lnb"][0])     # LayerNorm beta
    vecs = vecs.at[5, :out_ch].set(params["lb2"][0])  # head Linear2 bias
    vecs = vecs.at[6, :hid].set(params["as1"][0])     # att_src, layer 1 (zero-padded)
    vecs = vecs.at[7, :hid].set(params["as2"][0])     # att_src, layer 2 (zero-padded)

    # lin_edge is Linear(1, hid, bias=False): <lin_edge(e), att_edge> = e * <w_edge, att_edge>
    c_edge = jnp.stack([jnp.sum(params["we1"] * params["ae1"]),
                        jnp.sum(params["we2"] * params["ae2"])]).astype(jnp.float32)   # (2,)
    return {"wstack": wstack, "vecs": vecs, "c_edge": c_edge}


def init_params(key, in_ch, hid, out_ch, scale=0.1):
    ks = jax.random.split(key, 14)
    n = lambda k, s: (jax.random.normal(k, s, jnp.float32) * scale)
    return {
        # GATConv 1: lin (in_ch -> hid), att_src/att_dst/att_edge (hid), lin_edge (1 -> hid), bias
        "w1": n(ks[0], (in_ch, hid)), "as1": n(ks[1], (1, hid)), "ad1": n(ks[2], (1, hid)),
        "we1": n(ks[3], (1, hid)), "ae1": n(ks[4], (1, hid)), "b1": jnp.zeros((1, hid), jnp.float32),
        # GATConv 2: lin (hid -> hid)
        "w2": n(ks[5], (hid, hid)), "as2": n(ks[6], (1, hid)), "ad2": n(ks[7], (1, hid)),
        "we2": n(ks[8], (1, hid)), "ae2": n(ks[9], (1, hid)), "b2": jnp.zeros((1, hid), jnp.float32),
        # MLP head: Linear(hid, hid) -> ReLU -> LayerNorm(hid) -> Linear(hid, out_ch)
        "lw1": n(ks[10], (hid, hid)), "lb1": jnp.zeros((1, hid), jnp.float32),
        "lng": jnp.ones((1, hid), jnp.float32), "lnb": jnp.zeros((1, hid), jnp.float32),
        "lw2": n(ks[11], (hid, out_ch)), "lb2": jnp.zeros((1, out_ch), jnp.float32),
    }


if __name__ == "__main__":
    N, E = 16, 32
    in_ch, hidden_ch, out_ch, num_graphs = 8, 16, 4, 2

    key = jax.random.PRNGKey(0)
    kx, ke, kp = jax.random.split(key, 3)

    x = jax.random.normal(kx, (N, in_ch), jnp.float32)
    # deterministic edge set without self loops or duplicates (two ring offsets)
    src = jnp.concatenate([jnp.arange(N), jnp.arange(N)])
    dst = jnp.concatenate([(jnp.arange(N) + 1) % N, (jnp.arange(N) + 5) % N])
    edge_index = jnp.stack([src, dst]).astype(jnp.int32)             # (2, E)
    edge_attr = jax.random.uniform(ke, (E, 1), jnp.float32)          # (E, 1)
    batch_idx = jnp.concatenate([jnp.zeros(N // 2, jnp.int32),
                                 jnp.ones(N - N // 2, jnp.int32)])   # (N,)

    params = init_params(kp, in_ch, hidden_ch, out_ch)
    packed = pack_params(params, in_ch, hidden_ch, out_ch)           # done once, cached

    logits, ea_out = gat_graph_classifier(x, edge_index, edge_attr, batch_idx, packed,
                                          num_graphs, hidden_ch, out_ch)
    jax.block_until_ready(logits)
    assert logits.shape == (num_graphs, out_ch)
    assert bool(jnp.all(jnp.isfinite(logits)))
    print("KERNEL_OK")
</pallas_src>

<mosaic_0001>
module attributes {stable_mosaic.version = 11 : i64} {
  func.func private @main(%arg0: i32) attributes {dimension_semantics = [#tpu.dimension_semantics<core_parallel>], iteration_bounds = array<i64: 2>, tpu.core_type = #tpu.core_type<sc_scalar_subcore>, window_params = []} {
    return
  }
}

module attributes {stable_mosaic.version = 11 : i64} {
  func.func private @main(%arg0: i32) attributes {dimension_semantics = [#tpu.dimension_semantics<core_parallel>], iteration_bounds = array<i64: 2>, tpu.core_type = #tpu.core_type<sc_scalar_subcore>, window_params = []} {
    return
  }
}

module attributes {stable_mosaic.version = 11 : i64} {
  func.func @_gat_classifier_kernel(%arg0: i32, %arg1: memref<1x16x128xbf16, #tpu.memory_space<vmem>>, %arg2: memref<1x16x16xbf16, #tpu.memory_space<vmem>>, %arg3: memref<1x16x16xbf16, #tpu.memory_space<vmem>>, %arg4: memref<1x8x16xf32, #tpu.memory_space<vmem>>, %arg5: memref<2xf32, #tpu.memory_space<smem>>, %arg6: memref<4x128x128xbf16, #tpu.memory_space<vmem>>, %arg7: memref<8x128xf32, #tpu.memory_space<vmem>>, %arg8: memref<1x8x128xf32, #tpu.memory_space<vmem>>) attributes {dimension_semantics = [#tpu.dimension_semantics<parallel>], iteration_bounds = array<i64: 1>, scalar_prefetch = 0 : i64, scratch_operands = 0 : i64, tpu.core_type = #tpu.core_type<tc>, window_params = [{transform_indices = @transform_0, window_bounds = array<i64: 1, 16, 128>}, {transform_indices = @transform_1, window_bounds = array<i64: 1, 16, 16>}, {transform_indices = @transform_2, window_bounds = array<i64: 1, 16, 16>}, {transform_indices = @transform_3, window_bounds = array<i64: 1, 8, 16>}, {transform_indices = @transform_4, window_bounds = array<i64: 2>}, {pipeline_mode = #tpu.pipeline_mode<synchronous>, transform_indices = @transform_5, window_bounds = array<i64: 4, 128, 128>}, {pipeline_mode = #tpu.pipeline_mode<synchronous>, transform_indices = @transform_6, window_bounds = array<i64: 8, 128>}, {transform_indices = @transform_7, window_bounds = array<i64: 1, 8, 128>}]} {
    %c0 = arith.constant 0 : index
    %c0_0 = arith.constant 0 : index
    %0 = vector.load %arg7[%c0, %c0_0] : memref<8x128xf32, #tpu.memory_space<vmem>>, vector<8x128xf32>
    %c0_1 = arith.constant 0 : index
    %c0_2 = arith.constant 0 : index
    %c0_3 = arith.constant 0 : index
    %1 = vector.load %arg2[%c0_1, %c0_2, %c0_3] : memref<1x16x16xbf16, #tpu.memory_space<vmem>>, vector<1x16x16xbf16>
    %2 = arith.extf %1 : vector<1x16x16xbf16> to vector<1x16x16xf32>
    %c0_4 = arith.constant 0 : index
    %c0_5 = arith.constant 0 : index
    %c0_6 = arith.constant 0 : index
    %3 = vector.load %arg3[%c0_4, %c0_5, %c0_6] : memref<1x16x16xbf16, #tpu.memory_space<vmem>>, vector<1x16x16xbf16>
    %4 = arith.extf %3 : vector<1x16x16xbf16> to vector<1x16x16xf32>
    %cst = arith.constant 1.000000e+00 : f32
    %5 = vector.broadcast %cst : f32 to vector<1x16x16xf32>
    %6 = arith.subf %2, %5 : vector<1x16x16xf32>
    %cst_7 = arith.constant 1.000000e+09 : f32
    %7 = vector.broadcast %cst_7 : f32 to vector<1x16x16xf32>
    %8 = arith.mulf %6, %7 : vector<1x16x16xf32>
    %9 = vector.extract_strided_slice %0 {offsets = [6, 0], sizes = [1, 128], strides = [1, 1]} : vector<8x128xf32> to vector<1x128xf32>
    %10 = vector.shape_cast %9 : vector<1x128xf32> to vector<1x1x128xf32>
    %11 = vector.extract_strided_slice %0 {offsets = [7, 0], sizes = [1, 128], strides = [1, 1]} : vector<8x128xf32> to vector<1x128xf32>
    %12 = vector.shape_cast %11 : vector<1x128xf32> to vector<1x1x128xf32>
    %c0_8 = arith.constant 0 : index
    %c0_9 = arith.constant 0 : index
    %c0_10 = arith.constant 0 : index
    %13 = vector.load %arg1[%c0_8, %c0_9, %c0_10] : memref<1x16x128xbf16, #tpu.memory_space<vmem>>, vector<1x16x128xbf16>
    %14 = vector.shape_cast %13 : vector<1x16x128xbf16> to vector<16x128xbf16>
    %c0_11 = arith.constant 0 : index
    %c0_12 = arith.constant 0 : index
    %c0_13 = arith.constant 0 : index
    %15 = vector.load %arg6[%c0_11, %c0_12, %c0_13] : memref<4x128x128xbf16, #tpu.memory_space<vmem>>, vector<1x128x128xbf16>
    %16 = vector.shape_cast %15 : vector<1x128x128xbf16> to vector<128x128xbf16>
    %17 = vector.extract_strided_slice %0 {offsets = [0, 0], sizes = [1, 128], strides = [1, 1]} : vector<8x128xf32> to vector<1x128xf32>
    %c0_14 = arith.constant 0 : index
    %18 = memref.load %arg5[%c0_14] : memref<2xf32, #tpu.memory_space<smem>>
    %cst_15 = arith.constant dense<0.000000e+00> : vector<16x128xf32>
    %19 = tpu.matmul %14, %16, %cst_15 {dimension_numbers = #tpu.dot_dimension_numbers<[1], [0], [0], [1], [0, 0, 1, 1], [], []>} : vector<16x128xbf16>, vector<128x128xbf16>, vector<16x128xf32> -> vector<16x128xf32>
    %20 = vector.shape_cast %19 : vector<16x128xf32> to vector<1x16x128xf32>
    %21 = vector.extract_strided_slice %20 {offsets = [0, 0, 16], sizes = [1, 16, 1], strides = [1, 1, 1]} : vector<1x16x128xf32> to vector<1x16x1xf32>
    %cst_16 = arith.constant dense<0.000000e+00> : vector<1x1x16xf32>
    %22 = tpu.matmul %10, %20, %cst_16 {dimension_numbers = #tpu.dot_dimension_numbers<[2], [2], [1], [1], [0, 0, 0, 1, 1, 1], [0], [0]>} : vector<1x1x128xf32>, vector<1x16x128xf32>, vector<1x1x16xf32> -> vector<1x1x16xf32>
    %23 = vector.broadcast %21 : vector<1x16x1xf32> to vector<1x16x16xf32>
    %24 = vector.broadcast %22 : vector<1x1x16xf32> to vector<1x16x16xf32>
    %25 = arith.addf %23, %24 : vector<1x16x16xf32>
    %26 = vector.broadcast %18 : f32 to vector<1x16x16xf32>
    %27 = arith.mulf %26, %4 : vector<1x16x16xf32>
    %28 = arith.addf %25, %27 : vector<1x16x16xf32>
    %cst_17 = arith.constant 6.000000e-01 : f32
    %29 = vector.broadcast %cst_17 : f32 to vector<1x16x16xf32>
    %30 = arith.mulf %29, %28 : vector<1x16x16xf32>
    %31 = math.absf %28 : vector<1x16x16xf32>
    %cst_18 = arith.constant 4.000000e-01 : f32
    %32 = vector.broadcast %cst_18 : f32 to vector<1x16x16xf32>
    %33 = arith.mulf %32, %31 : vector<1x16x16xf32>
    %34 = arith.addf %30, %33 : vector<1x16x16xf32>
    %35 = arith.addf %34, %8 : vector<1x16x16xf32>
    %cst_19 = arith.constant dense<0xFF800000> : vector<1x16xf32>
    %36 = vector.multi_reduction <maximumf>, %35, %cst_19 [2] : vector<1x16x16xf32> to vector<1x16xf32>
    %37 = vector.shape_cast %36 : vector<1x16xf32> to vector<1x16x1xf32>
    %38 = vector.broadcast %37 : vector<1x16x1xf32> to vector<1x16x16xf32>
    %39 = arith.subf %35, %38 : vector<1x16x16xf32>
    %40 = math.exp %39 : vector<1x16x16xf32>
    %cst_20 = arith.constant dense<0.000000e+00> : vector<1x16xf32>
    %41 = vector.multi_reduction <add>, %40, %cst_20 [2] : vector<1x16x16xf32> to vector<1x16xf32>
    %42 = vector.shape_cast %41 : vector<1x16xf32> to vector<1x16x1xf32>
    %cst_21 = arith.constant dense<0.000000e+00> : vector<1x16x128xf32>
    %43 = tpu.matmul %40, %20, %cst_21 {dimension_numbers = #tpu.dot_dimension_numbers<[2], [1], [1], [2], [0, 0, 0, 1, 1, 2], [0], [0]>} : vector<1x16x16xf32>, vector<1x16x128xf32>, vector<1x16x128xf32> -> vector<1x16x128xf32>
    %44 = tpu.reciprocal %42 {approx = true} : vector<1x16x1xf32> -> vector<1x16x1xf32>
    %45 = vector.broadcast %44 : vector<1x16x1xf32> to vector<1x16x128xf32>
    %46 = arith.mulf %43, %45 : vector<1x16x128xf32>
    %47 = vector.shape_cast %17 : vector<1x128xf32> to vector<1x1x128xf32>
    %48 = vector.broadcast %47 : vector<1x1x128xf32> to vector<1x16x128xf32>
    %49 = arith.addf %46, %48 : vector<1x16x128xf32>
    %cst_22 = arith.constant 0.000000e+00 : f32
    %50 = vector.broadcast %cst_22 : f32 to vector<1x16x128xf32>
    %51 = arith.maximumf %49, %50 : vector<1x16x128xf32>
    %52 = vector.shape_cast %51 : vector<1x16x128xf32> to vector<16x128xf32>
    %53 = arith.truncf %52 : vector<16x128xf32> to vector<16x128xbf16>
    %c1 = arith.constant 1 : index
    %c0_23 = arith.constant 0 : index
    %c0_24 = arith.constant 0 : index
    %54 = vector.load %arg6[%c1, %c0_23, %c0_24] : memref<4x128x128xbf16, #tpu.memory_space<vmem>>, vector<1x128x128xbf16>
    %55 = vector.shape_cast %54 : vector<1x128x128xbf16> to vector<128x128xbf16>
    %56 = vector.extract_strided_slice %0 {offsets = [1, 0], sizes = [1, 128], strides = [1, 1]} : vector<8x128xf32> to vector<1x128xf32>
    %c1_25 = arith.constant 1 : index
    %57 = memref.load %arg5[%c1_25] : memref<2xf32, #tpu.memory_space<smem>>
    %cst_26 = arith.constant dense<0.000000e+00> : vector<16x128xf32>
    %58 = tpu.matmul %53, %55, %cst_26 {dimension_numbers = #tpu.dot_dimension_numbers<[1], [0], [0], [1], [0, 0, 1, 1], [], []>} : vector<16x128xbf16>, vector<128x128xbf16>, vector<16x128xf32> -> vector<16x128xf32>
    %59 = vector.shape_cast %58 : vector<16x128xf32> to vector<1x16x128xf32>
    %60 = vector.extract_strided_slice %59 {offsets = [0, 0, 16], sizes = [1, 16, 1], strides = [1, 1, 1]} : vector<1x16x128xf32> to vector<1x16x1xf32>
    %cst_27 = arith.constant dense<0.000000e+00> : vector<1x1x16xf32>
    %61 = tpu.matmul %12, %59, %cst_27 {dimension_numbers = #tpu.dot_dimension_numbers<[2], [2], [1], [1], [0, 0, 0, 1, 1, 1], [0], [0]>} : vector<1x1x128xf32>, vector<1x16x128xf32>, vector<1x1x16xf32> -> vector<1x1x16xf32>
    %62 = vector.broadcast %60 : vector<1x16x1xf32> to vector<1x16x16xf32>
    %63 = vector.broadcast %61 : vector<1x1x16xf32> to vector<1x16x16xf32>
    %64 = arith.addf %62, %63 : vector<1x16x16xf32>
    %65 = vector.broadcast %57 : f32 to vector<1x16x16xf32>
    %66 = arith.mulf %65, %4 : vector<1x16x16xf32>
    %67 = arith.addf %64, %66 : vector<1x16x16xf32>
    %cst_28 = arith.constant 6.000000e-01 : f32
    %68 = vector.broadcast %cst_28 : f32 to vector<1x16x16xf32>
    %69 = arith.mulf %68, %67 : vector<1x16x16xf32>
    %70 = math.absf %67 : vector<1x16x16xf32>
    %cst_29 = arith.constant 4.000000e-01 : f32
    %71 = vector.broadcast %cst_29 : f32 to vector<1x16x16xf32>
    %72 = arith.mulf %71, %70 : vector<1x16x16xf32>
    %73 = arith.addf %69, %72 : vector<1x16x16xf32>
    %74 = arith.addf %73, %8 : vector<1x16x16xf32>
    %cst_30 = arith.constant dense<0xFF800000> : vector<1x16xf32>
    %75 = vector.multi_reduction <maximumf>, %74, %cst_30 [2] : vector<1x16x16xf32> to vector<1x16xf32>
    %76 = vector.shape_cast %75 : vector<1x16xf32> to vector<1x16x1xf32>
    %77 = vector.broadcast %76 : vector<1x16x1xf32> to vector<1x16x16xf32>
    %78 = arith.subf %74, %77 : vector<1x16x16xf32>
    %79 = math.exp %78 : vector<1x16x16xf32>
    %cst_31 = arith.constant dense<0.000000e+00> : vector<1x16xf32>
    %80 = vector.multi_reduction <add>, %79, %cst_31 [2] : vector<1x16x16xf32> to vector<1x16xf32>
    %81 = vector.shape_cast %80 : vector<1x16xf32> to vector<1x16x1xf32>
    %cst_32 = arith.constant dense<0.000000e+00> : vector<1x16x128xf32>
    %82 = tpu.matmul %79, %59, %cst_32 {dimension_numbers = #tpu.dot_dimension_numbers<[2], [1], [1], [2], [0, 0, 0, 1, 1, 2], [0], [0]>} : vector<1x16x16xf32>, vector<1x16x128xf32>, vector<1x16x128xf32> -> vector<1x16x128xf32>
    %83 = tpu.reciprocal %81 {approx = true} : vector<1x16x1xf32> -> vector<1x16x1xf32>
    %84 = vector.broadcast %83 : vector<1x16x1xf32> to vector<1x16x128xf32>
    %85 = arith.mulf %82, %84 : vector<1x16x128xf32>
    %86 = vector.shape_cast %56 : vector<1x128xf32> to vector<1x1x128xf32>
    %87 = vector.broadcast %86 : vector<1x1x128xf32> to vector<1x16x128xf32>
    %88 = arith.addf %85, %87 : vector<1x16x128xf32>
    %c0_33 = arith.constant 0 : index
    %c0_34 = arith.constant 0 : index
    %c0_35 = arith.constant 0 : index
    %89 = vector.load %arg4[%c0_33, %c0_34, %c0_35] : memref<1x8x16xf32, #tpu.memory_space<vmem>>, vector<1x8x16xf32>
    %cst_36 = arith.constant dense<0.000000e+00> : vector<1x8x128xf32>
    %90 = tpu.matmul %89, %88, %cst_36 {dimension_numbers = #tpu.dot_dimension_numbers<[2], [1], [1], [2], [0, 0, 0, 1, 1, 2], [0], [0]>} : vector<1x8x16xf32>, vector<1x16x128xf32>, vector<1x8x128xf32> -> vector<1x8x128xf32>
    %91 = vector.shape_cast %90 : vector<1x8x128xf32> to vector<8x128xf32>
    %92 = arith.truncf %91 : vector<8x128xf32> to vector<8x128xbf16>
    %c2 = arith.constant 2 : index
    %c0_37 = arith.constant 0 : index
    %c0_38 = arith.constant 0 : index
    %93 = vector.load %arg6[%c2, %c0_37, %c0_38] : memref<4x128x128xbf16, #tpu.memory_space<vmem>>, vector<1x128x128xbf16>
    %94 = vector.shape_cast %93 : vector<1x128x128xbf16> to vector<128x128xbf16>
    %cst_39 = arith.constant dense<0.000000e+00> : vector<8x128xf32>
    %95 = tpu.matmul %92, %94, %cst_39 {dimension_numbers = #tpu.dot_dimension_numbers<[1], [0], [0], [1], [0, 0, 1, 1], [], []>} : vector<8x128xbf16>, vector<128x128xbf16>, vector<8x128xf32> -> vector<8x128xf32>
    %96 = vector.extract_strided_slice %0 {offsets = [2, 0], sizes = [1, 128], strides = [1, 1]} : vector<8x128xf32> to vector<1x128xf32>
    %97 = vector.broadcast %96 : vector<1x128xf32> to vector<8x128xf32>
    %98 = arith.addf %95, %97 : vector<8x128xf32>
    %cst_40 = arith.constant 0.000000e+00 : f32
    %99 = vector.broadcast %cst_40 : f32 to vector<8x128xf32>
    %100 = arith.maximumf %98, %99 : vector<8x128xf32>
    %cst_41 = arith.constant dense<0.000000e+00> : vector<8xf32>
    %101 = vector.multi_reduction <add>, %100, %cst_41 [1] : vector<8x128xf32> to vector<8xf32>
    %102 = vector.shape_cast %101 : vector<8xf32> to vector<8x1xf32>
    %cst_42 = arith.constant 6.250000e-02 : f32
    %103 = vector.broadcast %cst_42 : f32 to vector<8x1xf32>
    %104 = arith.mulf %102, %103 : vector<8x1xf32>
    %105 = arith.mulf %100, %100 : vector<8x128xf32>
    %cst_43 = arith.constant dense<0.000000e+00> : vector<8xf32>
    %106 = vector.multi_reduction <add>, %105, %cst_43 [1] : vector<8x128xf32> to vector<8xf32>
    %107 = vector.shape_cast %106 : vector<8xf32> to vector<8x1xf32>
    %cst_44 = arith.constant 6.250000e-02 : f32
    %108 = vector.broadcast %cst_44 : f32 to vector<8x1xf32>
    %109 = arith.mulf %107, %108 : vector<8x1xf32>
    %110 = arith.mulf %104, %104 : vector<8x1xf32>
    %111 = arith.subf %109, %110 : vector<8x1xf32>
    %cst_45 = arith.constant 0.000000e+00 : f32
    %112 = vector.broadcast %cst_45 : f32 to vector<8x1xf32>
    %113 = arith.maximumf %111, %112 : vector<8x1xf32>
    %114 = vector.broadcast %104 : vector<8x1xf32> to vector<8x128xf32>
    %115 = arith.subf %100, %114 : vector<8x128xf32>
    %cst_46 = arith.constant 9.99999974E-6 : f32
    %116 = vector.broadcast %cst_46 : f32 to vector<8x1xf32>
    %117 = arith.addf %113, %116 : vector<8x1xf32>
    %118 = math.rsqrt %117 : vector<8x1xf32>
    %119 = vector.broadcast %118 : vector<8x1xf32> to vector<8x128xf32>
    %120 = arith.mulf %115, %119 : vector<8x128xf32>
    %121 = vector.extract_strided_slice %0 {offsets = [3, 0], sizes = [1, 128], strides = [1, 1]} : vector<8x128xf32> to vector<1x128xf32>
    %122 = vector.broadcast %121 : vector<1x128xf32> to vector<8x128xf32>
    %123 = arith.mulf %120, %122 : vector<8x128xf32>
    %124 = vector.extract_strided_slice %0 {offsets = [4, 0], sizes = [1, 128], strides = [1, 1]} : vector<8x128xf32> to vector<1x128xf32>
    %125 = vector.broadcast %124 : vector<1x128xf32> to vector<8x128xf32>
    %126 = arith.addf %123, %125 : vector<8x128xf32>
    %127 = arith.truncf %126 : vector<8x128xf32> to vector<8x128xbf16>
    %c3 = arith.constant 3 : index
    %c0_47 = arith.constant 0 : index
    %c0_48 = arith.constant 0 : index
    %128 = vector.load %arg6[%c3, %c0_47, %c0_48] : memref<4x128x128xbf16, #tpu.memory_space<vmem>>, vector<1x128x128xbf16>
    %129 = vector.shape_cast %128 : vector<1x128x128xbf16> to vector<128x128xbf16>
    %cst_49 = arith.constant dense<0.000000e+00> : vector<8x128xf32>
    %130 = tpu.matmul %127, %129, %cst_49 {dimension_numbers = #tpu.dot_dimension_numbers<[1], [0], [0], [1], [0, 0, 1, 1], [], []>} : vector<8x128xbf16>, vector<128x128xbf16>, vector<8x128xf32> -> vector<8x128xf32>
    %131 = vector.extract_strided_slice %0 {offsets = [5, 0], sizes = [1, 128], strides = [1, 1]} : vector<8x128xf32> to vector<1x128xf32>
    %132 = vector.broadcast %131 : vector<1x128xf32> to vector<8x128xf32>
    %133 = arith.addf %130, %132 : vector<8x128xf32>
    %134 = vector.shape_cast %133 : vector<8x128xf32> to vector<1x8x128xf32>
    %c0_50 = arith.constant 0 : index
    %c0_51 = arith.constant 0 : index
    %c0_52 = arith.constant 0 : index
    %135 = vector.load %arg8[%c0_50, %c0_51, %c0_52] : memref<1x8x128xf32, #tpu.memory_space<vmem>>, vector<1x8x128xf32>
    tpu.vector_store %arg8[%c0_50, %c0_51, %c0_52], %134 {strides = array<i32>} : memref<1x8x128xf32, #tpu.memory_space<vmem>>, vector<1x8x128xf32>,
    return
  }
  func.func @transform_0(%arg0: i32) -> (i32, i32, i32) {
    %c0_i32 = arith.constant 0 : i32
    %c0_i32_0 = arith.constant 0 : i32
    %c0_i32_1 = arith.constant 0 : i32
    return %arg0, %c0_i32, %c0_i32_0 : i32, i32, i32
  }
  func.func @transform_1(%arg0: i32) -> (i32, i32, i32) {
    %c0_i32 = arith.constant 0 : i32
    %c0_i32_0 = arith.constant 0 : i32
    %c0_i32_1 = arith.constant 0 : i32
    return %arg0, %c0_i32, %c0_i32_0 : i32, i32, i32
  }
  func.func @transform_2(%arg0: i32) -> (i32, i32, i32) {
    %c0_i32 = arith.constant 0 : i32
    %c0_i32_0 = arith.constant 0 : i32
    %c0_i32_1 = arith.constant 0 : i32
    return %arg0, %c0_i32, %c0_i32_0 : i32, i32, i32
  }
  func.func @transform_3(%arg0: i32) -> (i32, i32, i32) {
    %c0_i32 = arith.constant 0 : i32
    %c0_i32_0 = arith.constant 0 : i32
    %c0_i32_1 = arith.constant 0 : i32
    return %arg0, %c0_i32, %c0_i32_0 : i32, i32, i32
  }
  func.func @transform_4(%arg0: i32) -> i32 {
    %c0_i32 = arith.constant 0 : i32
    %c0_i32_0 = arith.constant 0 : i32
    return %c0_i32 : i32
  }
  func.func @transform_5(%arg0: i32) -> (i32, i32, i32) {
    %c0_i32 = arith.constant 0 : i32
    %c0_i32_0 = arith.constant 0 : i32
    %c0_i32_1 = arith.constant 0 : i32
    %c0_i32_2 = arith.constant 0 : i32
    return %c0_i32, %c0_i32_0, %c0_i32_1 : i32, i32, i32
  }
  func.func @transform_6(%arg0: i32) -> (i32, i32) {
    %c0_i32 = arith.constant 0 : i32
    %c0_i32_0 = arith.constant 0 : i32
    %c0_i32_1 = arith.constant 0 : i32
    return %c0_i32, %c0_i32_0 : i32, i32
  }
  func.func @transform_7(%arg0: i32) -> (i32, i32, i32) {
    %c0_i32 = arith.constant 0 : i32
    %c0_i32_0 = arith.constant 0 : i32
    %c0_i32_1 = arith.constant 0 : i32
    return %arg0, %c0_i32, %c0_i32_0 : i32, i32, i32
  }
}

</mosaic_0001>

<bundles_post_ra>
// kernel: gat_graph_classifier.1
= control target key start
LH: loop header
LB: loop body
LE: loop exit
PB: predicated region body
PF: predicated region fallthrough
CT: control target
= control target key end

     0   :  { %12 = vsyncpa [#allocation3], 0  ;;  %s1649_s0 = inlined_call_operand.vmem [shape: bf16[1,16,128], index: 0, kind: input, shape index: {}]   ;;  %s1650_s1 = inlined_call_operand.vmem [shape: bf16[1,16,16], index: 1, kind: input, shape index: {}]   ;;  %s1651_s2 = inlined_call_operand.vmem [shape: bf16[1,16,16], index: 2, kind: input, shape index: {}]   ;;  %s1652_s3 = inlined_call_operand.vmem [shape: f32[1,8,16], index: 3, kind: input, shape index: {}]   ;;  %s1653_s4 = inlined_call_operand.vmem [shape: f32[2], index: 4, kind: input, shape index: {}]   ;;  %s1654_s5 = inlined_call_operand.vmem [shape: bf16[4,128,128], index: 5, kind: input, shape index: {}]   ;;  %s1655_s6 = inlined_call_operand.vmem [shape: f32[8,128], index: 6, kind: input, shape index: {}]   ;;  %s1656_s7 = inlined_call_operand.vmem [shape: f32[1,8,128], index: 7, kind: output, shape index: {}]  }
   0x1   :  { %s27_s26 = sshll.u32 %s1653_s4, 4  ;;  %s28_s26 = int_to_ptr.vmem [resolvable:$true] %s27_s26 }
   0x2   :  { %s1368_s27 = scalar_lea.vmem %s28_s26, 16  ;;  %p1373_p1 = scmp.lt.s32.totalorder %s28_s26, %s28_s26 }
   0x3   :  { %p1369_p0 = scmp.ne.s32.totalorder %s28_s26, %s1368_s27  ;;  %p1374_p2 = scmp.lt.s32.totalorder %s1368_s27, %s1368_s27 }
   0x5   :  { %p1375_p3 = por %p1374_p2, %p1373_p1 }
   0x7   :  { %p1376_p4 = pnand %p1375_p3, %p1369_p0 }
   0x9   :  { %1379 = shalt.err (!%p1376_p4)
}
   0xa   :  { %s1382_s28 = smov [#allocation2]  }
   0xb   :  { %30 = dma.vmem_to_smem %s28_s26, 16, %s1382_s28, [#allocation3]  }
   0xc   :  { %1380 = dma.done.wait [#allocation3], 16  }
   0xd   :  { %1381 = vsyncadd [#allocation3], 4294967280 }
   0xe   :  { %38 = sfence }
   0xf   :  { %v1317_v0 = vld [vmem:[%s1654_s5] sm:$0xff]   ;;  %v1383_v1 = vmov 0.0   ;;  %v1318_v2 = vld [vmem:[%s1654_s5 + $0x8] sm:$0xff]   ;;  %vm1384_vm0 = vmmov 0   ;;  %v1385_v3 = vmov 16   ;;  %v1319_v4 = vld [vmem:[%s1654_s5 + $0x10] sm:$0xff]   ;;  %v250_v19 = vlaneseq }
  0x10   :  { %1178 = vmatprep.subr.bf16.mxu0 %v1383_v1  ;;  %1194 = vmatprep.mubr.msk.bf16.mxu0 %vm1384_vm0, %v1383_v1  ;;  %v1320_v5 = vld [vmem:[%s1654_s5 + $0x18] sm:$0xff]   ;;  %v1321_v6 = vld [vmem:[%s1654_s5 + $0x20] sm:$0xff]   ;;  %v1322_v7 = vld [vmem:[%s1654_s5 + $0x28] sm:$0xff]   ;;  %v1386_v11 = vmov 0.0|0.0   ;;  %s71_s24 = sld [smem:[#allocation2]]  ;;  %vm271_vm1 = vcmask 130048  }
  0x11   :  { %1179 = vmatpush3.bf16.msra.mxu0 %v1317_v0  ;;  %1315 = vset.pattern.permute.xlu0 %v1385_v3  ;;  %v1323_v8 = vld [vmem:[%s1654_s5 + $0x30] sm:$0xff]   ;;  %v1324_v9 = vld [vmem:[%s1654_s5 + $0x38] sm:$0xff]   ;;  %v1325_v10 = vld [vmem:[%s1649_s0] sm:$0xff]   ;;  %v1480_v20 = vshrl.u32 %v250_v19, 7  ;;  %s1057_s18 = sld [smem:[#allocation2 + $0x1]] }
  0x12   :  { %1180 = vmatprep.subr.bf16.mxu0 %v1383_v1  ;;  %1202 = vmatprep.mubr.msk.f32.mxu1 %vm1384_vm0, %v1383_v1  ;;  %v1476_v17 = vld [vmem:[%s1655_s6] sm:$0xff] }
  0x13   :  { %1316 = vset.pattern.permute.xlu1 %v1385_v3  ;;  %1293 = vmatprep.subr.bf16.mxu1 %v1386_v11  ;;  %v168_v18 = vrot.slane %v1476_v17, 6  ;;  %v1485_v21 = vld [vmem:[%s1651_s2] sm:$0xff]   ;;  %v1490_v25 = vsub.s32 0, %v1480_v20 }
  0x14   :  { %v1123_v23 = vunpack.c.l.bf16 %v1485_v21  ;;  %v1124_v24 = vunpack.c.h.bf16 %v1485_v21  ;;  %v1118_v26 = vld [vmem:[%s1650_s1] sm:$0xff]  }
  0x15   :  { %1181 = vmatpush3.bf16.msra.mxu0 %v1318_v2  ;;  %v1119_v29 = vunpack.c.l.bf16 %v1118_v26  ;;  %v1120_v37 = vunpack.c.h.bf16 %v1118_v26  ;;  %v1326_v3 = vld [vmem:[%s1654_s5 + $0x40] sm:$0xff]  }
  0x16   :  { %1182 = vmatprep.subr.bf16.mxu0 %v1383_v1  ;;  %v256_v27 = vstv %s71_s24 }
  0x17   :  { %v257_v31 = vmul.f32 %v1123_v23, %v256_v27  ;;  %v258_v32 = vmul.f32 %v1124_v24, %v256_v27  ;;  %v1028_v38 = vadd.f32 -1.0, %v1119_v29  ;;  %v1029_v43 = vadd.f32 -1.0, %v1120_v37 }
  0x18   :  { %v491_v37 = vrot.slane %v1476_v17, 7 }
  0x19   :  { %1183 = vmatpush3.bf16.msra.mxu0 %v1319_v4  ;;  %v1500_v44 = vmul.f32 1e+09, %v1028_v38  ;;  %v1502_v50 = vmul.f32 1e+09, %v1029_v43  ;;  %v1327_v4 = vld [vmem:[%s1654_s5 + $0x48] sm:$0xff]  }
  0x1a   :  { %1184 = vmatprep.subr.bf16.mxu0 %v1383_v1 }
  0x1d   :  { %1185 = vmatpush3.bf16.msra.mxu0 %v1320_v5  ;;  %v1328_v5 = vld [vmem:[%s1654_s5 + $0x50] sm:$0xff]  }
  0x1e   :  { %1186 = vmatprep.subr.bf16.mxu0 %v1383_v1 }
  0x21   :  { %1187 = vmatpush3.bf16.msra.mxu0 %v1321_v6  ;;  %v1329_v6 = vld [vmem:[%s1654_s5 + $0x58] sm:$0xff]  }
  0x22   :  { %1188 = vmatprep.subr.bf16.mxu0 %v1383_v1 }
  0x25   :  { %1189 = vmatpush3.bf16.msra.mxu0 %v1322_v7  ;;  %v1330_v7 = vld [vmem:[%s1654_s5 + $0x60] sm:$0xff]  }
  0x26   :  { %1190 = vmatprep.subr.bf16.mxu0 %v1383_v1 }
  0x29   :  { %1191 = vmatpush3.bf16.msra.mxu0 %v1323_v8  ;;  %v1331_v8 = vld [vmem:[%s1654_s5 + $0x68] sm:$0xff]  }
  0x2a   :  { %1192 = vmatprep.subr.bf16.mxu0 %v1383_v1 }
  0x2d   :  { %1193 = vmatpush3.bf16.msra.mxu0 %v1324_v9  ;;  %v1332_v9 = vld [vmem:[%s1654_s5 + $0x70] sm:$0xff]  }
  0x2e   :  { %1300 = vmatprep.subr.bf16.mxu0 %v1386_v11 }
  0x30   :  { %1195 = vmatmul.mubr.bf16.vlgmr.msra.gmra.mrb[0].mxu0 %v1325_v10  ;;  %v1333_v10 = vld [vmem:[%s1654_s5 + $0x78] sm:$0xff]  }
  0x31   :  { %1236 = vmatprep.mubr.msk.f32.mxu0 %vm1384_vm0, %v1383_v1 }
 0x103   :  { %v160_v12 = vpop.f32.mrb[0].mxu0 }
 0x104   :  { %242 = vperm.xlu0 %1315, %v160_v12   ;;  %v1196_v13 = vpop.f32.mrb[1].mxu0 }
 0x105   :  { %v163_v14 = vpop.f32.mrb[2].mxu0 }
 0x106   :  { %v1294_v15 = vpack.c.bf16 %v163_v14, %v160_v12  ;;  %v1197_v16 = vpop.f32.mrb[3].mxu0 }
 0x108   :  { %247 = vperm.xlu0 %1315, %v163_v14   ;;  %1295 = vmatpush3.bf16.xpose.msra.mxu1 %v1294_v15  ;;  %v378_v14 = vrot.slane %v1476_v17, %v1490_v25 }
 0x109   :  { %1297 = vmatprep.subr.bf16.mxu1 %v1294_v15 }
 0x10f   :  { %1203 = vmatmul.mubr.f32.vlgmr.msra.gmra.mrb[0].mxu1 %v168_v18 }
 0x110   :  { %1299 = vmatpush3.bf16.msra.mxu1 %v1294_v15 }
 0x111   :  { %1212 = vmatprep.subr.bf16.mxu1 %v1383_v1 }
 0x183   :  { %v243_v22 = vpop.permute.xlu0 %242 }
 0x187   :  { %v248_v34 = vpop.permute.xlu0 %247 }
 0x1e2   :  { %v236_v28 = vpop.f32.mrb[0].mxu1 }
 0x1e3   :  { %v253_v30 = vrot.slane %v236_v28, %v1490_v25  ;;  %v1204_v33 = vpop.f32.mrb[1].mxu1 }
 0x1e5   :  { %v254_v35 = vadd.f32 %v253_v30, %v243_v22  ;;  %v255_v36 = vadd.f32 %v253_v30, %v248_v34 }
 0x1e7   :  { %v259_v39 = vadd.f32 %v257_v31, %v254_v35  ;;  %v260_v40 = vadd.f32 %v258_v32, %v255_v36 }
 0x1e9   :  { %v264_v41 = vand.u32 2147483647, %v260_v40  ;;  %v263_v42 = vand.u32 2147483647, %v259_v39  ;;  %v261_v45 = vmul.f32 0.6, %v259_v39  ;;  %v579_v39 = vstv %s1057_s18 }
 0x1ea   :  { %v262_v47 = vmul.f32 0.6, %v260_v40  ;;  %v581_v43 = vmul.f32 %v1124_v24, %v579_v39 }
 0x1eb   :  { %v265_v46 = vmul.f32 0.4, %v263_v42  ;;  %v266_v48 = vmul.f32 0.4, %v264_v41  ;;  %v580_v42 = vmul.f32 %v1123_v23, %v579_v39 }
 0x1ed   :  { %v267_v49 = vadd.f32 %v265_v46, %v261_v45  ;;  %v268_v51 = vadd.f32 %v266_v48, %v262_v47 }
 0x1ef   :  { %v269_v52 = vadd.f32 %v267_v49, %v1500_v44  ;;  %v270_v54 = vadd.f32 %v268_v51, %v1502_v50 }
 0x1f1   :  { %v272_v53 = vsel %vm271_vm1, %v269_v52, -inf  ;;  %v275_v55 = vsel %vm271_vm1, %v270_v54, -inf }
 0x1f2   :  { %273 = vmax.xlane.f32.xlu1 %v272_v53 }
 0x1f6   :  { %276 = vmax.xlane.f32.xlu1 %v275_v55 }
 0x27f   :  { %v274_v56 = vpop.xlane.xlu1 %273 }
 0x280   :  { %v278_v57 = vsub.f32 %v269_v52, %v274_v56 }
 0x282   :  { %v280_v58 = vmul.f32 1.442695, %v278_v57 }
 0x283   :  { %v277_v59 = vpop.xlane.xlu1 %276 }
 0x284   :  { %1350 = vpow2.f32 %v280_v58  ;;  %v279_v60 = vsub.f32 %v270_v54, %v277_v59 }
 0x286   :  { %v282_v61 = vmul.f32 1.442695, %v279_v60 }
 0x288   :  { %1352 = vpow2.f32 %v282_v61 }
 0x28e   :  { %v1351_v62 = vpop.eup %1350 }
 0x28f   :  { %1209 = vmatprep.mubr.msk.f32.mxu1 %vm271_vm1, %v1351_v62  ;;  %v284_v63 = vsel %vm271_vm1, %v1351_v62, 0.0 }
 0x290   :  { %285 = vadd.xlane.f32.xlu0 %v284_v63 }
 0x292   :  { %v1353_v0 = vpop.eup %1352 }
 0x293   :  { %1210 = vmatmul.mubr.msk.f32.vlgmr.msra.gmra.mrb[2].mxu1 %vm271_vm1, %v1353_v0  ;;  %v287_v2 = vsel %vm271_vm1, %v1353_v0, 0.0 }
 0x294   :  { %288 = vadd.xlane.f32.xlu1 %v287_v2  ;;  %1228 = vmatprep.mubr.msk.bf16.mxu1 %vm1384_vm0, %v1383_v1 }
 0x295   :  { %1213 = vmatpush3.bf16.msra.mxu1 %v1326_v3 }
 0x296   :  { %1214 = vmatprep.subr.bf16.mxu1 %v1383_v1 }
 0x299   :  { %1215 = vmatpush3.bf16.msra.mxu1 %v1327_v4  ;;  %v1334_v4 = vld [vmem:[%s1654_s5 + $0x80] sm:$0xff]  }
 0x29a   :  { %1216 = vmatprep.subr.bf16.mxu1 %v1383_v1 }
 0x29d   :  { %1217 = vmatpush3.bf16.msra.mxu1 %v1328_v5  ;;  %v1335_v5 = vld [vmem:[%s1654_s5 + $0x88] sm:$0xff]  }
 0x29e   :  { %1218 = vmatprep.subr.bf16.mxu1 %v1383_v1 }
 0x2a1   :  { %1219 = vmatpush3.bf16.msra.mxu1 %v1329_v6  ;;  %v1336_v6 = vld [vmem:[%s1654_s5 + $0x90] sm:$0xff]  }
 0x2a2   :  { %1220 = vmatprep.subr.bf16.mxu1 %v1383_v1 }
 0x2a5   :  { %1221 = vmatpush3.bf16.msra.mxu1 %v1330_v7  ;;  %v1337_v7 = vld [vmem:[%s1654_s5 + $0x98] sm:$0xff]  }
 0x2a6   :  { %1222 = vmatprep.subr.bf16.mxu1 %v1383_v1 }
 0x2a9   :  { %1223 = vmatpush3.bf16.msra.mxu1 %v1331_v8  ;;  %v1338_v8 = vld [vmem:[%s1654_s5 + $0xa0] sm:$0xff]  }
 0x2aa   :  { %1224 = vmatprep.subr.bf16.mxu1 %v1383_v1 }
 0x2ad   :  { %1225 = vmatpush3.bf16.msra.mxu1 %v1332_v9  ;;  %v1339_v9 = vld [vmem:[%s1654_s5 + $0xa8] sm:$0xff]  }
 0x2ae   :  { %1226 = vmatprep.subr.bf16.mxu1 %v1383_v1 }
 0x2b1   :  { %1227 = vmatpush3.bf16.msra.mxu1 %v1333_v10  ;;  %v1340_v10 = vld [vmem:[%s1654_s5 + $0xb0] sm:$0xff]  }
 0x2b2   :  { %1253 = vmatprep.subr.bf16.mxu1 %v1383_v1 }
 0x31d   :  { %v286_v13 = vpop.xlane.xlu0 %285 }
 0x321   :  { %v289_v12 = vpop.xlane.xlu1 %288 }
 0x322   :  { %1354 = vrcp.f32 %v289_v12 }
 0x323   :  { %1356 = vrcp.f32 %v286_v13 }
 0x32c   :  { %v1355_v15 = vpop.eup %1354 }
 0x32d   :  { %v1357_v18 = vpop.eup %1356 }
 0x366   :  { %v1211_v16 = vpop.f32.mrb[2].mxu1 }
 0x367   :  { %v374_v19 = vmul.f32 %v1355_v15, %v1211_v16  ;;  %v362_v22 = vpop.f32.mrb[3].mxu1 }
 0x368   :  { %v373_v26 = vmul.f32 %v1357_v18, %v362_v22 }
 0x369   :  { %v380_v27 = vadd.f32 %v378_v14, %v374_v19 }
 0x36a   :  { %v379_v28 = vadd.f32 %v378_v14, %v373_v26  ;;  %v699_v14 = vsub.s32 1, %v1480_v20 }
 0x36b   :  { %v382_v29 = vmax.f32 %v380_v27, 0.0 }
 0x36c   :  { %v381_v30 = vmax.f32 %v379_v28, 0.0  ;;  %v700_v15 = vrot.slane %v1476_v17, %v699_v14 }
 0x36e   :  { %v383_v31 = vpack.c.bf16 %v382_v29, %v381_v30 }
 0x370   :  { %1229 = vmatmul.mubr.bf16.vlgmr.msra.gmra.mrb[4].mxu1 %v383_v31  ;;  %v703_v31 = vld [vmem:[%s1652_s3] sm:$0xff] }
 0x371   :  { %1269 = vmatprep.mubr.msk.bf16.mxu1 %vm1384_vm0, %v1383_v1  ;;  %1254 = vmatpush3.bf16.msra.mxu1 %v1334_v4 }
 0x372   :  { %1255 = vmatprep.subr.bf16.mxu1 %v1383_v1 }
 0x375   :  { %1256 = vmatpush3.bf16.msra.mxu1 %v1335_v5 }
 0x376   :  { %1257 = vmatprep.subr.bf16.mxu1 %v1383_v1 }
 0x379   :  { %1258 = vmatpush3.bf16.msra.mxu1 %v1336_v6 }
 0x37a   :  { %1259 = vmatprep.subr.bf16.mxu1 %v1383_v1 }
 0x37d   :  { %1260 = vmatpush3.bf16.msra.mxu1 %v1337_v7 }
 0x37e   :  { %1261 = vmatprep.subr.bf16.mxu1 %v1383_v1 }
 0x381   :  { %1262 = vmatpush3.bf16.msra.mxu1 %v1338_v8 }
 0x382   :  { %1263 = vmatprep.subr.bf16.mxu1 %v1383_v1 }
 0x385   :  { %1264 = vmatpush3.bf16.msra.mxu1 %v1339_v9 }
 0x386   :  { %1265 = vmatprep.subr.bf16.mxu1 %v1383_v1 }
 0x389   :  { %1266 = vmatpush3.bf16.msra.mxu1 %v1340_v10 }
 0x38a   :  { %1267 = vmatprep.subr.bf16.mxu1 %v1383_v1 }
 0x443   :  { %v484_v32 = vpop.f32.mrb[4].mxu1 }
 0x444   :  { %565 = vperm.xlu1 %1316, %v484_v32   ;;  %v1230_v33 = vpop.f32.mrb[5].mxu1 }
 0x445   :  { %v487_v34 = vpop.f32.mrb[6].mxu1 }
 0x446   :  { %v1301_v35 = vpack.c.bf16 %v487_v34, %v484_v32  ;;  %v1231_v36 = vpop.f32.mrb[7].mxu1  ;;  %v1341_v32 = vld [vmem:[%s1654_s5 + $0xb8] sm:$0xff]  }
 0x447   :  { %1268 = vmatpush3.bf16.msra.mxu1 %v1341_v32  ;;  %v797_v36 = vsub.s32 2, %v1480_v20 }
 0x448   :  { %570 = vperm.xlu1 %1316, %v487_v34   ;;  %1302 = vmatpush3.bf16.xpose.msra.mxu0 %v1301_v35 }
 0x449   :  { %1304 = vmatprep.subr.bf16.mxu0 %v1301_v35 }
 0x44f   :  { %1237 = vmatmul.mubr.f32.vlgmr.msra.gmra.mrb[4].mxu0 %v491_v37  ;;  %v798_v37 = vrot.slane %v1476_v17, %v797_v36 }
 0x450   :  { %1306 = vmatpush3.bf16.msra.mxu0 %v1301_v35 }
 0x451   :  { %1307 = vmatprep.subr.bf16.mxu0 %v1386_v11 }
 0x4c3   :  { %v566_v38 = vpop.permute.xlu1 %565 }
 0x4c7   :  { %v571_v46 = vpop.permute.xlu1 %570 }
 0x522   :  { %v559_v40 = vpop.f32.mrb[4].mxu0 }
 0x523   :  { %v576_v41 = vrot.slane %v559_v40, %v1490_v25  ;;  %v1238_v45 = vpop.f32.mrb[5].mxu0 }
 0x525   :  { %v577_v47 = vadd.f32 %v576_v41, %v566_v38  ;;  %v578_v48 = vadd.f32 %v576_v41, %v571_v46  ;;  %v1342_v46 = vld [vmem:[%s1654_s5 + $0xc0] sm:$0xff]  }
 0x527   :  { %v582_v49 = vadd.f32 %v580_v42, %v577_v47  ;;  %v583_v51 = vadd.f32 %v581_v43, %v578_v48  ;;  %v1343_v47 = vld [vmem:[%s1654_s5 + $0xc8] sm:$0xff]   ;;  %v1344_v48 = vld [vmem:[%s1654_s5 + $0xd0] sm:$0xff]  }
 0x529   :  { %v586_v52 = vand.u32 2147483647, %v582_v49  ;;  %v587_v11 = vand.u32 2147483647, %v583_v51  ;;  %v585_v53 = vmul.f32 0.6, %v583_v51 }
 0x52a   :  { %v584_v55 = vmul.f32 0.6, %v582_v49  ;;  %v1345_v49 = vld [vmem:[%s1654_s5 + $0xd8] sm:$0xff]   ;;  %v1346_v51 = vld [vmem:[%s1654_s5 + $0xe0] sm:$0xff]  }
 0x52b   :  { %v589_v54 = vmul.f32 0.4, %v587_v11  ;;  %v588_v56 = vmul.f32 0.4, %v586_v52  ;;  %v1347_v52 = vld [vmem:[%s1654_s5 + $0xe8] sm:$0xff]   ;;  %v1348_v11 = vld [vmem:[%s1654_s5 + $0xf0] sm:$0xff]  }
 0x52d   :  { %v591_v57 = vadd.f32 %v589_v54, %v585_v53  ;;  %v590_v25 = vadd.f32 %v588_v56, %v584_v55  ;;  %v1349_v53 = vld [vmem:[%s1654_s5 + $0xf8] sm:$0xff]  }
 0x52f   :  { %v593_v58 = vadd.f32 %v591_v57, %v1502_v50  ;;  %v592_v23 = vadd.f32 %v590_v25, %v1500_v44 }
 0x531   :  { %v597_v21 = vsel %vm271_vm1, %v593_v58, -inf  ;;  %v594_v24 = vsel %vm271_vm1, %v592_v23, -inf }
 0x532   :  { %598 = vmax.xlane.f32.xlu0 %v597_v21  ;;  %595 = vmax.xlane.f32.xlu1 %v594_v24  ;;  %v904_v24 = vsub.s32 3, %v1480_v20 }
 0x5bf   :  { %v599_v59 = vpop.xlane.xlu0 %598  ;;  %v596_v60 = vpop.xlane.xlu1 %595 }
 0x5c0   :  { %v601_v61 = vsub.f32 %v593_v58, %v599_v59  ;;  %v600_v62 = vsub.f32 %v592_v23, %v596_v60  ;;  %v909_v59 = vsub.s32 4, %v1480_v20 }
 0x5c2   :  { %v604_v63 = vmul.f32 1.442695, %v601_v61  ;;  %v602_v0 = vmul.f32 1.442695, %v600_v62  ;;  %v905_v61 = vrot.slane %v1476_v17, %v904_v24 }
 0x5c4   :  { %1358 = vpow2.f32 %v604_v63 }
 0x5c5   :  { %1360 = vpow2.f32 %v602_v0 }
 0x5ce   :  { %v1359_v2 = vpop.eup %1358 }
 0x5cf   :  { %v1361_v3 = vpop.eup %1360  ;;  %v609_v50 = vsel %vm271_vm1, %v1359_v2, 0.0 }
 0x5d0   :  { %1243 = vmatprep.mubr.msk.f32.mxu0 %vm271_vm1, %v1361_v3  ;;  %v606_v44 = vsel %vm271_vm1, %v1361_v3, 0.0 }
 0x5d1   :  { %1244 = vmatmul.mubr.msk.f32.vlgmr.msra.gmra.mrb[6].mxu0 %vm271_vm1, %v1359_v2  ;;  %607 = vadd.xlane.f32.xlu0 %v606_v44  ;;  %v932_v44 = vsub.s32 5, %v1480_v20 }
 0x5d2   :  { %1250 = vmatprep.mubr.msk.f32.mxu0 %vm1384_vm0, %v1383_v1 }
 0x5d5   :  { %610 = vadd.xlane.f32.xlu0 %v609_v50  ;;  %v933_v50 = vrot.slane %v1476_v17, %v932_v44 }
 0x65e   :  { %v608_v12 = vpop.xlane.xlu0 %607 }
 0x662   :  { %v611_v13 = vpop.xlane.xlu0 %610 }
 0x663   :  { %1362 = vrcp.f32 %v611_v13 }
 0x664   :  { %1364 = vrcp.f32 %v608_v12 }
 0x66d   :  { %v1363_v16 = vpop.eup %1362 }
 0x66e   :  { %v1365_v19 = vpop.eup %1364 }
 0x6a4   :  { %v1245_v18 = vpop.f32.mrb[6].mxu0 }
 0x6a5   :  { %v696_v22 = vmul.f32 %v1363_v16, %v1245_v18  ;;  %v684_v26 = vpop.f32.mrb[7].mxu0 }
 0x6a6   :  { %v695_v27 = vmul.f32 %v1365_v19, %v684_v26 }
 0x6a7   :  { %v702_v28 = vadd.f32 %v700_v15, %v696_v22 }
 0x6a8   :  { %v701_v29 = vadd.f32 %v700_v15, %v695_v27 }
 0x6aa   :  { %v1308_v30 = vpack.c.bf16 %v702_v28, %v701_v29 }
 0x6ac   :  { %1309 = vmatpush3.bf16.msra.mxu0 %v1308_v30 }
 0x6ad   :  { %1273 = vmatprep.subr.bf16.mxu0 %v1383_v1 }
 0x6af   :  { %1251 = vmatmul.mubr.msk.f32.vlgmr.msra.gmra.mrb[8].mxu0 %vm271_vm1, %v703_v31 }
 0x6b0   :  { %1289 = vmatprep.mubr.msk.bf16.mxu0 %vm1384_vm0, %v1383_v1  ;;  %1274 = vmatpush3.bf16.msra.mxu0 %v1342_v46 }
 0x6b1   :  { %1275 = vmatprep.subr.bf16.mxu0 %v1383_v1 }
 0x6b4   :  { %1276 = vmatpush3.bf16.msra.mxu0 %v1343_v47 }
 0x6b5   :  { %1277 = vmatprep.subr.bf16.mxu0 %v1383_v1 }
 0x6b8   :  { %1278 = vmatpush3.bf16.msra.mxu0 %v1344_v48 }
 0x6b9   :  { %1279 = vmatprep.subr.bf16.mxu0 %v1383_v1 }
 0x6bc   :  { %1280 = vmatpush3.bf16.msra.mxu0 %v1345_v49 }
 0x6bd   :  { %1281 = vmatprep.subr.bf16.mxu0 %v1383_v1 }
 0x6c0   :  { %1282 = vmatpush3.bf16.msra.mxu0 %v1346_v51 }
 0x6c1   :  { %1283 = vmatprep.subr.bf16.mxu0 %v1383_v1 }
 0x6c4   :  { %1284 = vmatpush3.bf16.msra.mxu0 %v1347_v52 }
 0x6c5   :  { %1285 = vmatprep.subr.bf16.mxu0 %v1383_v1 }
 0x6c8   :  { %1286 = vmatpush3.bf16.msra.mxu0 %v1348_v11 }
 0x6c9   :  { %1287 = vmatprep.subr.bf16.mxu0 %v1383_v1  ;;  %v910_v1 = vrot.slane %v1476_v17, %v909_v59 }
 0x6cc   :  { %1288 = vmatpush3.bf16.msra.mxu0 %v1349_v53 }
 0x782   :  { %v773_v33 = vpop.f32.mrb[8].mxu0 }
 0x783   :  { %v777_v34 = vpack.c.bf16 %v773_v33, %v773_v33  ;;  %v1252_v35 = vpop.f32.mrb[9].mxu0 }
 0x785   :  { %1270 = vmatmul.mubr.bf16.vlgmr.msra.gmra.mrb[8].mxu1 %v777_v34 }
 0x858   :  { %v881_v38 = vpop.f32.mrb[8].mxu1 }
 0x859   :  { %v882_v39 = vadd.f32 %v881_v38, %v798_v37  ;;  %v1271_v40 = vpop.f32.mrb[9].mxu1 }
 0x85a   :  { %v884_v41 = vpop.f32.mrb[10].mxu1 }
 0x85b   :  { %v887_v42 = vmax.f32 %v882_v39, 0.0  ;;  %v1272_v43 = vpop.f32.mrb[11].mxu1 }
 0x85d   :  { %888 = vadd.xlane.f32.xlu0 %v887_v42  ;;  %v891_v45 = vmul.f32 %v887_v42, %v887_v42 }
 0x861   :  { %892 = vadd.xlane.f32.xlu0 %v891_v45 }
 0x8ea   :  { %v889_v54 = vpop.xlane.xlu0 %888 }
 0x8eb   :  { %v890_v55 = vmul.f32 0.0625, %v889_v54 }
 0x8ed   :  { %v895_v57 = vmul.f32 %v890_v55, %v890_v55  ;;  %v898_v60 = vsub.f32 %v887_v42, %v890_v55 }
 0x8ee   :  { %v893_v56 = vpop.xlane.xlu0 %892 }
 0x8ef   :  { %v894_v25 = vmul.f32 0.0625, %v893_v56 }
 0x8f1   :  { %v896_v58 = vsub.f32 %v894_v25, %v895_v57 }
 0x8f3   :  { %v897_v23 = vmax.f32 %v896_v58, 0.0 }
 0x8f5   :  { %v899_v21 = vadd.f32 1e-05, %v897_v23 }
 0x8f7   :  { %1366 = vrsqrt.f32 %v899_v21 }
 0x901   :  { %v1367_v62 = vpop.eup %1366 }
 0x902   :  { %v901_v63 = vmul.f32 %v1367_v62, %v898_v60 }
 0x904   :  { %v906_v0 = vmul.f32 %v905_v61, %v901_v63 }
 0x906   :  { %v911_v2 = vadd.f32 %v910_v1, %v906_v0 }
 0x908   :  { %v912_v3 = vpack.c.bf16 %v911_v2, %v911_v2 }
 0x90a   :  { %1290 = vmatmul.mubr.bf16.vlgmr.msra.gmra.mrb[12].mxu0 %v912_v3 }
 0x9dd   :  { %v1016_v4 = vpop.f32.mrb[12].mxu0 }
 0x9de   :  { %v1017_v5 = vadd.f32 %v1016_v4, %v933_v50  ;;  %v1291_v6 = vpop.f32.mrb[13].mxu0 }
 0x9df   :  { %v1019_v7 = vpop.f32.mrb[14].mxu0 }
 0x9e0   :  { %1022 = vst [vmem:[%s1656_s7] sm:$0xff] %v1017_v5  ;;  %v1292_v8 = vpop.f32.mrb[15].mxu0 }
 0x9e1   :  { %1027 = vsyncpa [#allocation3], 1 }

</bundles_post_ra>
